<compile_context>
chip_gen: v6e
topology: v6e:2x2x1
jax: 0.10.0
libtpu: 0.0.40
codegen_flags: <defaults>
</compile_context>

<pallas_src>
import jax
import jax.numpy as jnp
from jax.experimental import pallas as pl
from jax.experimental.pallas import tpu as pltpu


# Logical widths: 2 -> 100 -> 500 -> 2 ; padded (lane-aligned) widths below.
D_IN = 2
H1_LOG, H2_LOG, D_OUT = 100, 500, 2
H1, H2, OUT_PAD = 128, 512, 128


def encoder_kernel(x_ref, w1_ref, b1_ref, w2_ref, b2_ref, w3_ref, b3_ref, o_ref):
    x = x_ref[...]                                                   # (TB, 2) f32

    # ---- Layer 1: Linear(2,100)+ReLU on the VPU (K=2 is wasted on the MXU) --
    h1 = x[:, 0:1] * w1_ref[0:1, :] + x[:, 1:2] * w1_ref[1:2, :] + b1_ref[...]
    h1 = jnp.maximum(h1, 0.0)                                        # (TB, 128)

    # ---- Layer 2: Linear(100,500)+ReLU, dominant MXU matmul, bf16 in/f32 acc
    h2 = jnp.dot(h1.astype(jnp.bfloat16), w2_ref[...],
                 preferred_element_type=jnp.float32)                 # (TB, 512)
    h2 = jnp.maximum(h2 + b2_ref[...], 0.0)

    # ---- Layer 3: Linear(500,2) into a lane-dense 128-wide padded tile ------
    out = jnp.dot(h2.astype(jnp.bfloat16), w3_ref[...],
                  preferred_element_type=jnp.float32)                # (TB, 128)
    o_ref[...] = (out + b3_ref[...]).astype(o_ref.dtype)


def _round_up(n, m):
    return ((n + m - 1) // m) * m


def pad_params(params):
    """Zero-pad weights to lane-aligned widths (exact); bf16 for MXU operands."""
    w1, b1, w2, b2, w3, b3 = params
    w1p = jnp.zeros((D_IN, H1), jnp.float32).at[:, :H1_LOG].set(w1)
    b1p = jnp.zeros((1, H1), jnp.float32).at[:, :H1_LOG].set(b1)
    w2p = jnp.zeros((H1, H2), jnp.float32).at[:H1_LOG, :H2_LOG].set(w2)
    b2p = jnp.zeros((1, H2), jnp.float32).at[:, :H2_LOG].set(b2)
    w3p = jnp.zeros((H2, OUT_PAD), jnp.float32).at[:H2_LOG, :D_OUT].set(w3)
    b3p = jnp.zeros((1, OUT_PAD), jnp.float32).at[:, :D_OUT].set(b3)
    return (w1p, b1p,
            w2p.astype(jnp.bfloat16), b2p,
            w3p.astype(jnp.bfloat16), b3p)


def encoder_forward(x, params, *, tb_max=1024):
    """x: (B, 2) float32 -> (B, 2) float32."""
    w1p, b1p, w2p, b2p, w3p, b3p = pad_params(params)
    B = x.shape[0]

    # Batch tile: big enough to amortize per-step overhead, small enough to
    # keep (x + h1 + h2 + out) tiles well under v7x's VMEM.  TB is always a
    # multiple of 8 (sublane alignment).
    TB = min(_round_up(tb_max, 8), _round_up(B, 8))
    B_pad = _round_up(B, TB)
    x_pad = x if B_pad == B else jnp.pad(x, ((0, B_pad - B), (0, 0)))
    grid = (B_pad // TB,)

    def resident(shape):
        # Block index never changes -> Pallas keeps the buffer resident in VMEM.
        return pl.BlockSpec(shape, lambda i: (0, 0))

    flops = 2 * B_pad * (D_IN * H1 + H1 * H2 + H2 * OUT_PAD)
    bytes_accessed = (x_pad.size * 4 + B_pad * OUT_PAD * 4
                      + w1p.size * 4 + b1p.size * 4
                      + w2p.size * 2 + b2p.size * 4
                      + w3p.size * 2 + b3p.size * 4)

    out = pl.pallas_call(
        encoder_kernel,
        out_shape=jax.ShapeDtypeStruct((B_pad, OUT_PAD), jnp.float32),
        grid=grid,
        in_specs=[
            pl.BlockSpec((TB, D_IN), lambda i: (i, 0)),       # x: tiled over batch
            resident(w1p.shape), resident(b1p.shape),
            resident(w2p.shape), resident(b2p.shape),
            resident(w3p.shape), resident(b3p.shape),
        ],
        out_specs=pl.BlockSpec((TB, OUT_PAD), lambda i: (i, 0)),
        compiler_params=pltpu.CompilerParams(
            dimension_semantics=("parallel",),        # shard batch steps across TCs
            vmem_limit_bytes=32 * 1024 * 1024,        # explicit, safe on v5e/v6e/v7x
        ),
        cost_estimate=pl.CostEstimate(
            flops=flops, transcendentals=0, bytes_accessed=bytes_accessed),
    )(x_pad, w1p, b1p, w2p, b2p, w3p, b3p)

    return out[:B, :D_OUT]


def init_params(key):
    """Deterministic init mimicking nn.Linear default (U(-1/sqrt(fan_in), +))."""
    def linear(k, fan_in, fan_out):
        kw, kb = jax.random.split(k)
        bound = 1.0 / jnp.sqrt(float(fan_in))
        # stored as (in, out) so the kernel computes x @ W (== torch x @ W.T)
        w = jax.random.uniform(kw, (fan_in, fan_out), jnp.float32, -bound, bound)
        b = jax.random.uniform(kb, (1, fan_out), jnp.float32, -bound, bound)
        return w, b

    k1, k2, k3 = jax.random.split(key, 3)
    w1, b1 = linear(k1, D_IN, H1_LOG)
    w2, b2 = linear(k2, H1_LOG, H2_LOG)
    w3, b3 = linear(k3, H2_LOG, D_OUT)
    return (w1, b1, w2, b2, w3, b3)


def encoder_ref(x, params):
    """Pure-f32 reference (matches the PyTorch module exactly)."""
    w1, b1, w2, b2, w3, b3 = params
    h1 = jnp.maximum(x @ w1 + b1, 0.0)
    h2 = jnp.maximum(h1 @ w2 + b2, 0.0)
    return h2 @ w3 + b3


def encoder_ref_matched(x, params):
    """Reference mirroring the kernel's padding + bf16 MXU inputs (tight check)."""
    w1p, b1p, w2p, b2p, w3p, b3p = pad_params(params)
    h1 = jnp.maximum(x[:, 0:1] * w1p[0:1, :] + x[:, 1:2] * w1p[1:2, :] + b1p, 0.0)
    h2 = jnp.maximum(
        jnp.dot(h1.astype(jnp.bfloat16), w2p,
                preferred_element_type=jnp.float32) + b2p, 0.0)
    out = jnp.dot(h2.astype(jnp.bfloat16), w3p,
                  preferred_element_type=jnp.float32) + b3p
    return out[:, :D_OUT]


if __name__ == "__main__":
    key = jax.random.PRNGKey(0)
    k_params, k_x1, k_x2 = jax.random.split(key, 3)

    params = init_params(k_params)

    # Small demo batch.
    x = jax.random.normal(k_x1, (8, D_IN), dtype=jnp.float32)
    out = jax.block_until_ready(encoder_forward(x, params))
    assert out.shape == (8, D_OUT)

    # Tight check vs. a reference with identical padding / bf16 rounding.
    ref_matched = encoder_ref_matched(x, params)
    assert jnp.allclose(out, ref_matched, atol=1e-3, rtol=1e-3)

    # Loose check vs. the pure-f32 module reference (layer-2/3 MXU inputs are
    # bf16-rounded, accumulation stays f32).
    ref_f32 = encoder_ref(x, params)
    assert jnp.allclose(out, ref_f32, atol=1e-1, rtol=1e-1)

    # Ragged batch + multi-step grid (exercises batch padding & pipelining).
    x2 = jax.random.normal(k_x2, (200, D_IN), dtype=jnp.float32)
    out2 = jax.block_until_ready(encoder_forward(x2, params, tb_max=64))
    assert out2.shape == (200, D_OUT)
    assert jnp.allclose(out2, encoder_ref_matched(x2, params), atol=1e-3, rtol=1e-3)

    print("KERNEL_OK")
</pallas_src>

<mosaic_0001>
module attributes {stable_mosaic.version = 11 : i64} {
  func.func @encoder_kernel(%arg0: i32, %arg1: memref<8x2xf32, #tpu.memory_space<vmem>>, %arg2: memref<2x128xf32, #tpu.memory_space<vmem>>, %arg3: memref<1x128xf32, #tpu.memory_space<vmem>>, %arg4: memref<128x512xbf16, #tpu.memory_space<vmem>>, %arg5: memref<1x512xf32, #tpu.memory_space<vmem>>, %arg6: memref<512x128xbf16, #tpu.memory_space<vmem>>, %arg7: memref<1x128xf32, #tpu.memory_space<vmem>>, %arg8: memref<8x128xf32, #tpu.memory_space<vmem>>) attributes {dimension_semantics = [#tpu.dimension_semantics<parallel>], iteration_bounds = array<i64: 1>, scalar_prefetch = 0 : i64, scratch_operands = 0 : i64, tpu.core_type = #tpu.core_type<tc>, window_params = [{transform_indices = @transform_0, window_bounds = array<i64: 8, 2>}, {pipeline_mode = #tpu.pipeline_mode<synchronous>, transform_indices = @transform_1, window_bounds = array<i64: 2, 128>}, {pipeline_mode = #tpu.pipeline_mode<synchronous>, transform_indices = @transform_2, window_bounds = array<i64: 1, 128>}, {pipeline_mode = #tpu.pipeline_mode<synchronous>, transform_indices = @transform_3, window_bounds = array<i64: 128, 512>}, {pipeline_mode = #tpu.pipeline_mode<synchronous>, transform_indices = @transform_4, window_bounds = array<i64: 1, 512>}, {pipeline_mode = #tpu.pipeline_mode<synchronous>, transform_indices = @transform_5, window_bounds = array<i64: 512, 128>}, {pipeline_mode = #tpu.pipeline_mode<synchronous>, transform_indices = @transform_6, window_bounds = array<i64: 1, 128>}, {transform_indices = @transform_7, window_bounds = array<i64: 8, 128>}]} {
    %c0 = arith.constant 0 : index
    %c0_0 = arith.constant 0 : index
    %0 = vector.load %arg1[%c0, %c0_0] : memref<8x2xf32, #tpu.memory_space<vmem>>, vector<8x2xf32>
    %1 = vector.extract_strided_slice %0 {offsets = [0, 0], sizes = [8, 1], strides = [1, 1]} : vector<8x2xf32> to vector<8x1xf32>
    %c0_1 = arith.constant 0 : index
    %c0_2 = arith.constant 0 : index
    %2 = vector.load %arg2[%c0_1, %c0_2] : memref<2x128xf32, #tpu.memory_space<vmem>>, vector<1x128xf32>
    %3 = vector.broadcast %1 : vector<8x1xf32> to vector<8x128xf32>
    %4 = vector.broadcast %2 : vector<1x128xf32> to vector<8x128xf32>
    %5 = arith.mulf %3, %4 : vector<8x128xf32>
    %6 = vector.extract_strided_slice %0 {offsets = [0, 1], sizes = [8, 1], strides = [1, 1]} : vector<8x2xf32> to vector<8x1xf32>
    %c1 = arith.constant 1 : index
    %c0_3 = arith.constant 0 : index
    %7 = vector.load %arg2[%c1, %c0_3] : memref<2x128xf32, #tpu.memory_space<vmem>>, vector<1x128xf32>
    %8 = vector.broadcast %6 : vector<8x1xf32> to vector<8x128xf32>
    %9 = vector.broadcast %7 : vector<1x128xf32> to vector<8x128xf32>
    %10 = arith.mulf %8, %9 : vector<8x128xf32>
    %11 = arith.addf %5, %10 : vector<8x128xf32>
    %c0_4 = arith.constant 0 : index
    %c0_5 = arith.constant 0 : index
    %12 = vector.load %arg3[%c0_4, %c0_5] : memref<1x128xf32, #tpu.memory_space<vmem>>, vector<1x128xf32>
    %13 = vector.broadcast %12 : vector<1x128xf32> to vector<8x128xf32>
    %14 = arith.addf %11, %13 : vector<8x128xf32>
    %cst = arith.constant 0.000000e+00 : f32
    %15 = vector.broadcast %cst : f32 to vector<8x128xf32>
    %16 = arith.maximumf %14, %15 : vector<8x128xf32>
    %17 = arith.truncf %16 : vector<8x128xf32> to vector<8x128xbf16>
    %c0_6 = arith.constant 0 : index
    %c0_7 = arith.constant 0 : index
    %18 = vector.load %arg4[%c0_6, %c0_7] : memref<128x512xbf16, #tpu.memory_space<vmem>>, vector<128x512xbf16>
    %cst_8 = arith.constant dense<0.000000e+00> : vector<8x512xf32>
    %19 = tpu.matmul %17, %18, %cst_8 {dimension_numbers = #tpu.dot_dimension_numbers<[1], [0], [0], [1], [0, 0, 1, 1], [], []>} : vector<8x128xbf16>, vector<128x512xbf16>, vector<8x512xf32> -> vector<8x512xf32>
    %c0_9 = arith.constant 0 : index
    %c0_10 = arith.constant 0 : index
    %20 = vector.load %arg5[%c0_9, %c0_10] : memref<1x512xf32, #tpu.memory_space<vmem>>, vector<1x512xf32>
    %21 = vector.broadcast %20 : vector<1x512xf32> to vector<8x512xf32>
    %22 = arith.addf %19, %21 : vector<8x512xf32>
    %cst_11 = arith.constant 0.000000e+00 : f32
    %23 = vector.broadcast %cst_11 : f32 to vector<8x512xf32>
    %24 = arith.maximumf %22, %23 : vector<8x512xf32>
    %25 = arith.truncf %24 : vector<8x512xf32> to vector<8x512xbf16>
    %c0_12 = arith.constant 0 : index
    %c0_13 = arith.constant 0 : index
    %26 = vector.load %arg6[%c0_12, %c0_13] : memref<512x128xbf16, #tpu.memory_space<vmem>>, vector<512x128xbf16>
    %cst_14 = arith.constant dense<0.000000e+00> : vector<8x128xf32>
    %27 = tpu.matmul %25, %26, %cst_14 {dimension_numbers = #tpu.dot_dimension_numbers<[1], [0], [0], [1], [0, 0, 1, 1], [], []>} : vector<8x512xbf16>, vector<512x128xbf16>, vector<8x128xf32> -> vector<8x128xf32>
    %c0_15 = arith.constant 0 : index
    %c0_16 = arith.constant 0 : index
    %28 = vector.load %arg7[%c0_15, %c0_16] : memref<1x128xf32, #tpu.memory_space<vmem>>, vector<1x128xf32>
    %29 = vector.broadcast %28 : vector<1x128xf32> to vector<8x128xf32>
    %30 = arith.addf %27, %29 : vector<8x128xf32>
    %c0_17 = arith.constant 0 : index
    %c0_18 = arith.constant 0 : index
    %31 = vector.load %arg8[%c0_17, %c0_18] : memref<8x128xf32, #tpu.memory_space<vmem>>, vector<8x128xf32>
    tpu.vector_store %arg8[%c0_17, %c0_18], %30 {strides = array<i32>} : memref<8x128xf32, #tpu.memory_space<vmem>>, vector<8x128xf32>,
    return
  }
  func.func @transform_0(%arg0: i32) -> (i32, i32) {
    %c0_i32 = arith.constant 0 : i32
    %c0_i32_0 = arith.constant 0 : i32
    return %arg0, %c0_i32 : i32, i32
  }
  func.func @transform_1(%arg0: i32) -> (i32, i32) {
    %c0_i32 = arith.constant 0 : i32
    %c0_i32_0 = arith.constant 0 : i32
    %c0_i32_1 = arith.constant 0 : i32
    return %c0_i32, %c0_i32_0 : i32, i32
  }
  func.func @transform_2(%arg0: i32) -> (i32, i32) {
    %c0_i32 = arith.constant 0 : i32
    %c0_i32_0 = arith.constant 0 : i32
    %c0_i32_1 = arith.constant 0 : i32
    return %c0_i32, %c0_i32_0 : i32, i32
  }
  func.func @transform_3(%arg0: i32) -> (i32, i32) {
    %c0_i32 = arith.constant 0 : i32
    %c0_i32_0 = arith.constant 0 : i32
    %c0_i32_1 = arith.constant 0 : i32
    return %c0_i32, %c0_i32_0 : i32, i32
  }
  func.func @transform_4(%arg0: i32) -> (i32, i32) {
    %c0_i32 = arith.constant 0 : i32
    %c0_i32_0 = arith.constant 0 : i32
    %c0_i32_1 = arith.constant 0 : i32
    return %c0_i32, %c0_i32_0 : i32, i32
  }
  func.func @transform_5(%arg0: i32) -> (i32, i32) {
    %c0_i32 = arith.constant 0 : i32
    %c0_i32_0 = arith.constant 0 : i32
    %c0_i32_1 = arith.constant 0 : i32
    return %c0_i32, %c0_i32_0 : i32, i32
  }
  func.func @transform_6(%arg0: i32) -> (i32, i32) {
    %c0_i32 = arith.constant 0 : i32
    %c0_i32_0 = arith.constant 0 : i32
    %c0_i32_1 = arith.constant 0 : i32
    return %c0_i32, %c0_i32_0 : i32, i32
  }
  func.func @transform_7(%arg0: i32) -> (i32, i32) {
    %c0_i32 = arith.constant 0 : i32
    %c0_i32_0 = arith.constant 0 : i32
    return %arg0, %c0_i32 : i32, i32
  }
}

</mosaic_0001>

<bundles_post_ra>
// kernel: tpu_custom_call.1
= control target key start
LH: loop header
LB: loop body
LE: loop exit
PB: predicated region body
PF: predicated region fallthrough
CT: control target
= control target key end

     0   :  { %12 = vsyncpa [#allocation3], 0  ;;  %s1098_s0 = inlined_call_operand.vmem [shape: f32[8,2], index: 0, kind: input, shape index: {}]   ;;  %s1099_s1 = inlined_call_operand.vmem [shape: f32[2,128], index: 1, kind: input, shape index: {}]   ;;  %s1100_s2 = inlined_call_operand.vmem [shape: f32[1,128], index: 2, kind: input, shape index: {}]   ;;  %s1101_s3 = inlined_call_operand.hbm [shape: bf16[128,512], index: 3, kind: input, shape index: {}]   ;;  %s1102_s4 = inlined_call_operand.vmem [shape: f32[1,512], index: 4, kind: input, shape index: {}]   ;;  %s1103_s5 = inlined_call_operand.hbm [shape: bf16[512,128], index: 5, kind: input, shape index: {}]   ;;  %s1104_s6 = inlined_call_operand.vmem [shape: f32[1,128], index: 6, kind: input, shape index: {}]   ;;  %s1105_s7 = inlined_call_operand.hbm [shape: f32[8,128], index: 7, kind: output, shape index: {}]  }
   0x1   :  { %13 = vsyncpa [#allocation6], 0 }
   0x2   :  { %14 = vsyncpa [#allocation4], 0  ;;  %s1022_s24 = smov [#allocation2]  }
   0x3   :  { %s26_s25 = sshll.u32 %s1022_s24, 4  ;;  %s27_s25 = int_to_ptr.vmem [resolvable:$true] %s26_s25 }
   0x4   :  { %s964_s26 = scalar_lea.vmem %s27_s25, 4096  ;;  %p969_p1 = scmp.lt.s32.totalorder %s27_s25, %s27_s25 }
   0x5   :  { %p965_p0 = scmp.ne.s32.totalorder %s27_s25, %s964_s26  ;;  %p970_p2 = scmp.lt.s32.totalorder %s964_s26, %s964_s26 }
   0x7   :  { %p971_p3 = por %p970_p2, %p969_p1 }
   0x9   :  { %p972_p4 = pnand %p971_p3, %p965_p0 }
   0xb   :  { %975 = shalt.err (!%p972_p4)
}
   0xc   :  { %s1023_s27 = smov 256   ;;  %s1024_s28 = smov 16  }
   0xd   :  { %32 = dma.hbm_to_vmem [thread:$0]  %s1101_s3, 4096, %s27_s25, [#allocation3], %s1023_s27, %s1023_s27, %s1024_s28  }
   0xe   :  { %s1025_s8 = smov [#allocation5]  }
   0xf   :  { %s40_s9 = sshll.u32 %s1025_s8, 4  ;;  %s41_s9 = int_to_ptr.vmem [resolvable:$true] %s40_s9 }
  0x10   :  { %s984_s10 = scalar_lea.vmem %s41_s9, 4096  ;;  %p989_p6 = scmp.lt.s32.totalorder %s41_s9, %s41_s9 }
  0x11   :  { %p985_p5 = scmp.ne.s32.totalorder %s41_s9, %s984_s10  ;;  %p990_p7 = scmp.lt.s32.totalorder %s984_s10, %s984_s10 }
  0x13   :  { %p991_p8 = por %p990_p7, %p989_p6 }
  0x15   :  { %p992_p9 = pnand %p991_p8, %p985_p5 }
  0x17   :  { %995 = shalt.err (!%p992_p9)
}
  0x18   :  { %s1026_s11 = smov 64   ;;  %s1027_s12 = smov 4  }
  0x19   :  { %46 = dma.hbm_to_vmem [thread:$0]  %s1103_s5, 4096, %s41_s9, [#allocation6], %s1026_s11, %s1026_s11, %s1027_s12  }
  0x1a   :  { %1016 = dma.done.wait [#allocation3], 4096  }
  0x1b   :  { %1017 = vsyncadd [#allocation3], 4294963200 }
  0x1c   :  { %1018 = dma.done.wait [#allocation6], 4096  }
  0x1d   :  { %1019 = vsyncadd [#allocation6], 4294963200  ;;  %v1028_v0 = vmov 0   ;;  %v56_v1 = vld [vmem:[%s1098_s0] sm:$0xff]  ;;  %v878_v3 = vld [vmem:[#allocation2 + $0xec] ss:$16 sps:$4 sm:$0xff]  }
  0x1e   :  { %874 = vset.pattern.permute.xlu0 %v1028_v0  ;;  %335 = vmatprep.mubr.bf16.mxu0 %v1028_v0  ;;  %v876_v2 = vld [vmem:[#allocation2 + $0xe4] ss:$16 sps:$4 sm:$0xff]   ;;  %v880_v4 = vld [vmem:[#allocation2 + $0xe0] ss:$16 sps:$4 sm:$0xff]   ;;  %v881_v5 = vld [vmem:[#allocation2 + $0xe8] ss:$16 sps:$4 sm:$0xff]  }
  0x1f   :  { %376 = vmatprep.mubr.bf16.mxu1 %v1028_v0  ;;  %60 = vperm.xlu0 %874, %v56_v1   ;;  %v882_v6 = vld [vmem:[#allocation2 + $0xc4] ss:$16 sps:$4 sm:$0xff]   ;;  %v884_v7 = vld [vmem:[#allocation2 + $0xcc] ss:$16 sps:$4 sm:$0xff]   ;;  %v1029_v8 = vmov 1   ;;  %s1030_s21 = smov [#allocation7]  }
  0x20   :  { %303 = vmatprep.subr.bf16.mxu0 %v876_v2  ;;  %344 = vmatprep.subr.bf16.mxu1 %v878_v3  ;;  %v886_v9 = vld [vmem:[#allocation2 + $0xc0] ss:$16 sps:$4 sm:$0xff]   ;;  %v887_v10 = vld [vmem:[#allocation2 + $0xc8] ss:$16 sps:$4 sm:$0xff]   ;;  %v888_v11 = vld [vmem:[#allocation2 + $0xa4] ss:$16 sps:$4 sm:$0xff]  }
  0x21   :  { %304 = vmatpush1.bf16.msra.mxu0 %v880_v4  ;;  %345 = vmatpush1.bf16.msra.mxu1 %v881_v5  ;;  %v890_v12 = vld [vmem:[#allocation2 + $0xac] ss:$16 sps:$4 sm:$0xff]   ;;  %v892_v13 = vld [vmem:[#allocation2 + $0xa0] ss:$16 sps:$4 sm:$0xff]   ;;  %v893_v14 = vld [vmem:[#allocation2 + $0xa8] ss:$16 sps:$4 sm:$0xff]  }
  0x22   :  { %305 = vmatprep.subr.bf16.mxu0 %v882_v6  ;;  %346 = vmatprep.subr.bf16.mxu1 %v884_v7  ;;  %v894_v15 = vld [vmem:[#allocation2 + $0x84] ss:$16 sps:$4 sm:$0xff]   ;;  %v896_v16 = vld [vmem:[#allocation2 + $0x8c] ss:$16 sps:$4 sm:$0xff]   ;;  %v898_v17 = vld [vmem:[#allocation2 + $0x80] ss:$16 sps:$4 sm:$0xff]  }
  0x23   :  { %875 = vset.pattern.permute.xlu0 %v1029_v8  ;;  %v899_v18 = vld [vmem:[#allocation2 + $0x88] ss:$16 sps:$4 sm:$0xff]   ;;  %v900_v19 = vld [vmem:[#allocation2 + $0x64] ss:$16 sps:$4 sm:$0xff]   ;;  %v902_v20 = vld [vmem:[#allocation2 + $0x6c] ss:$16 sps:$4 sm:$0xff]  }
  0x24   :  { %70 = vperm.xlu0 %875, %v56_v1   ;;  %v904_v21 = vld [vmem:[#allocation2 + $0x60] ss:$16 sps:$4 sm:$0xff]   ;;  %v905_v22 = vld [vmem:[#allocation2 + $0x68] ss:$16 sps:$4 sm:$0xff]   ;;  %v906_v23 = vld [vmem:[#allocation2 + $0x44] ss:$16 sps:$4 sm:$0xff]  }
  0x25   :  { %306 = vmatpush1.bf16.msra.mxu0 %v886_v9  ;;  %347 = vmatpush1.bf16.msra.mxu1 %v887_v10  ;;  %v908_v24 = vld [vmem:[#allocation2 + $0x4c] ss:$16 sps:$4 sm:$0xff]   ;;  %v910_v25 = vld [vmem:[#allocation2 + $0x40] ss:$16 sps:$4 sm:$0xff]   ;;  %v911_v26 = vld [vmem:[#allocation2 + $0x48] ss:$16 sps:$4 sm:$0xff]  }
  0x26   :  { %307 = vmatprep.subr.bf16.mxu0 %v888_v11  ;;  %348 = vmatprep.subr.bf16.mxu1 %v890_v12  ;;  %v912_v27 = vld [vmem:[#allocation2 + $0x24] ss:$16 sps:$4 sm:$0xff]   ;;  %v914_v28 = vld [vmem:[#allocation2 + $0x2c] ss:$16 sps:$4 sm:$0xff]   ;;  %v916_v29 = vld [vmem:[#allocation2 + $0x20] ss:$16 sps:$4 sm:$0xff]  }
  0x27   :  { %v917_v30 = vld [vmem:[#allocation2 + $0x28] ss:$16 sps:$4 sm:$0xff]   ;;  %v918_v31 = vld [vmem:[#allocation2 + $0x4] ss:$16 sps:$4 sm:$0xff]   ;;  %v920_v32 = vld [vmem:[#allocation2 + $0xc] ss:$16 sps:$4 sm:$0xff]  }
  0x28   :  { %v922_v33 = vld [vmem:[#allocation2] ss:$16 sps:$4 sm:$0xff]   ;;  %v923_v34 = vld [vmem:[#allocation2 + $0x8] ss:$16 sps:$4 sm:$0xff]   ;;  %s743_s22 = sshll.u32 %s1030_s21, 4  ;;  %s744_s22 = int_to_ptr.vmem [resolvable:$true] %s743_s22 }
  0x29   :  { %308 = vmatpush1.bf16.msra.mxu0 %v892_v13  ;;  %349 = vmatpush1.bf16.msra.mxu1 %v893_v14  ;;  %v924_v35 = vld [vmem:[#allocation5 + $0x78] sm:$0xff]   ;;  %v753_v38 = vld [vmem:[%s1099_s1] ss:$0 sm:$0xff]  ;;  %v754_v39 = vld [vmem:[%s1099_s1 + $0x1] ss:$0 sm:$0xff]  ;;  %v123_v14 = vlaneseq  ;;  %s996_s23 = scalar_lea.vmem %s744_s22, 128  ;;  %p1001_p11 = scmp.lt.s32.totalorder %s744_s22, %s744_s22 }
  0x2a   :  { %309 = vmatprep.subr.bf16.mxu0 %v894_v15  ;;  %350 = vmatprep.subr.bf16.mxu1 %v896_v16  ;;  %v925_v36 = vld [vmem:[#allocation5 + $0xf8] sm:$0xff]   ;;  %v755_v43 = vld [vmem:[%s1100_s2] ss:$0 sm:$0xff]  ;;  %v928_v50 = vld [vmem:[#allocation5 + $0x70] sm:$0xff]   ;;  %p997_p10 = scmp.ne.s32.totalorder %s744_s22, %s996_s23  ;;  %p1002_p12 = scmp.lt.s32.totalorder %s996_s23, %s996_s23 }
  0x2b   :  { %v926_v47 = vld [vmem:[#allocation5 + $0x38] sm:$0xff]   ;;  %v929_v51 = vld [vmem:[#allocation5 + $0xf0] sm:$0xff]   ;;  %v932_v54 = vld [vmem:[#allocation5 + $0x68] sm:$0xff]   ;;  %v124_v15 = vshrl.u32 %v123_v14, 7 }
  0x2c   :  { %v927_v48 = vld [vmem:[#allocation5 + $0xb8] sm:$0xff]   ;;  %v930_v52 = vld [vmem:[#allocation5 + $0x30] sm:$0xff]   ;;  %v933_v55 = vld [vmem:[#allocation5 + $0xe8] sm:$0xff]   ;;  %p1003_p13 = por %p1002_p12, %p1001_p11 }
  0x2d   :  { %310 = vmatpush1.bf16.msra.mxu0 %v898_v17  ;;  %351 = vmatpush1.bf16.msra.mxu1 %v899_v18  ;;  %v931_v53 = vld [vmem:[#allocation5 + $0xb0] sm:$0xff]   ;;  %v934_v56 = vld [vmem:[#allocation5 + $0x28] sm:$0xff]   ;;  %v936_v58 = vld [vmem:[#allocation5 + $0x60] sm:$0xff]   ;;  %v125_v16 = vsub.s32 0, %v124_v15  ;;  %v133_v17 = vsub.s32 2, %v124_v15 }
  0x2e   :  { %311 = vmatprep.subr.bf16.mxu0 %v900_v19  ;;  %352 = vmatprep.subr.bf16.mxu1 %v902_v20  ;;  %v935_v57 = vld [vmem:[#allocation5 + $0xa8] sm:$0xff]   ;;  %v937_v59 = vld [vmem:[#allocation5 + $0xe0] sm:$0xff]   ;;  %v940_v62 = vld [vmem:[#allocation5 + $0x58] sm:$0xff]   ;;  %v129_v19 = vsub.s32 1, %v124_v15  ;;  %v137_v20 = vsub.s32 3, %v124_v15  ;;  %p1004_p0 = pnand %p1003_p13, %p997_p10 }
  0x2f   :  { %v938_v60 = vld [vmem:[#allocation5 + $0x20] sm:$0xff]   ;;  %v941_v63 = vld [vmem:[#allocation5 + $0xd8] sm:$0xff]   ;;  %v944_v2 = vld [vmem:[#allocation5 + $0x50] sm:$0xff]  }
  0x30   :  { %v939_v61 = vld [vmem:[#allocation5 + $0xa0] sm:$0xff]   ;;  %v942_v0 = vld [vmem:[#allocation5 + $0x18] sm:$0xff]   ;;  %v945_v3 = vld [vmem:[#allocation5 + $0xd0] sm:$0xff]  }
  0x31   :  { %312 = vmatpush1.bf16.msra.mxu0 %v904_v21  ;;  %353 = vmatpush1.bf16.msra.mxu1 %v905_v22  ;;  %v943_v1 = vld [vmem:[#allocation5 + $0x98] sm:$0xff]   ;;  %v946_v4 = vld [vmem:[#allocation5 + $0x10] sm:$0xff]   ;;  %v948_v6 = vld [vmem:[#allocation5 + $0x48] sm:$0xff]  }
  0x32   :  { %313 = vmatprep.subr.bf16.mxu0 %v906_v23  ;;  %354 = vmatprep.subr.bf16.mxu1 %v908_v24  ;;  %v947_v5 = vld [vmem:[#allocation5 + $0x90] sm:$0xff]   ;;  %v949_v7 = vld [vmem:[#allocation5 + $0xc8] sm:$0xff]   ;;  %v952_v10 = vld [vmem:[#allocation5 + $0x40] sm:$0xff]  }
  0x33   :  { %v950_v8 = vld [vmem:[#allocation5 + $0x8] sm:$0xff]   ;;  %v953_v11 = vld [vmem:[#allocation5 + $0xc0] sm:$0xff]  }
  0x34   :  { %v951_v9 = vld [vmem:[#allocation5 + $0x88] sm:$0xff]   ;;  %v954_v12 = vld [vmem:[#allocation5] sm:$0xff]  }
  0x35   :  { %314 = vmatpush1.bf16.msra.mxu0 %v910_v25  ;;  %355 = vmatpush1.bf16.msra.mxu1 %v911_v26  ;;  %v955_v13 = vld [vmem:[#allocation5 + $0x80] sm:$0xff]  }
  0x36   :  { %315 = vmatprep.subr.bf16.mxu0 %v912_v27  ;;  %356 = vmatprep.subr.bf16.mxu1 %v914_v28  ;;  %v121_v18 = vld [vmem:[%s1102_s4] sm:$0xf] }
  0x37   :  { %v126_v21 = vrot.slane %v121_v18, %v125_v16  ;;  %v134_v22 = vrot.slane %v121_v18, %v133_v17  ;;  %v130_v23 = vrot.slane %v121_v18, %v129_v19  ;;  %v138_v24 = vrot.slane %v121_v18, %v137_v20 }
  0x39   :  { %316 = vmatpush1.bf16.msra.mxu0 %v916_v29  ;;  %357 = vmatpush1.bf16.msra.mxu1 %v917_v30 }
  0x3a   :  { %317 = vmatprep.subr.bf16.mxu0 %v918_v31  ;;  %358 = vmatprep.subr.bf16.mxu1 %v920_v32 }
  0x3d   :  { %318 = vmatpush1.bf16.msra.mxu0 %v922_v33  ;;  %359 = vmatpush1.bf16.msra.mxu1 %v923_v34 }
  0x3e   :  { %821 = vmatprep.subr.bf16.mxu0 %v924_v35  ;;  %843 = vmatprep.subr.bf16.mxu1 %v925_v36 }
  0x9a   :  { %v61_v37 = vpop.permute.xlu0 %60 }
  0x9b   :  { %v67_v41 = vmul.f32 %v753_v38, %v61_v37 }
  0x9f   :  { %v71_v40 = vpop.permute.xlu0 %70 }
  0xa0   :  { %v77_v42 = vmul.f32 %v754_v39, %v71_v40 }
  0xa2   :  { %v78_v44 = vadd.f32 %v77_v42, %v67_v41 }
  0xa4   :  { %v86_v45 = vadd.f32 %v755_v43, %v78_v44 }
  0xa6   :  { %v87_v46 = vmax.f32 %v86_v45, 0.0 }
  0xa8   :  { %v88_v49 = vpack.c.bf16 %v87_v46, %v87_v46 }
  0xaa   :  { %336 = vmatmul.mubr.bf16.vlgmr.msra.gmra.mxu0 %v88_v49  ;;  %377 = vmatmul.mubr.bf16.vlgmr.msra.gmra.mxu1 %v88_v49 }
  0xab   :  { %822 = vmatpush3.bf16.msra.mxu0 %v926_v47  ;;  %844 = vmatpush3.bf16.msra.mxu1 %v927_v48  ;;  %v788_v47 = vld [vmem:[%s1104_s6] ss:$0 sm:$0xff] }
  0xac   :  { %823 = vmatprep.subr.bf16.mxu0 %v928_v50  ;;  %845 = vmatprep.subr.bf16.mxu1 %v929_v51 }
  0xaf   :  { %824 = vmatpush3.bf16.msra.mxu0 %v930_v52  ;;  %846 = vmatpush3.bf16.msra.mxu1 %v931_v53 }
  0xb0   :  { %825 = vmatprep.subr.bf16.mxu0 %v932_v54  ;;  %847 = vmatprep.subr.bf16.mxu1 %v933_v55 }
  0xb3   :  { %826 = vmatpush3.bf16.msra.mxu0 %v934_v56  ;;  %848 = vmatpush3.bf16.msra.mxu1 %v935_v57 }
  0xb4   :  { %827 = vmatprep.subr.bf16.mxu0 %v936_v58  ;;  %849 = vmatprep.subr.bf16.mxu1 %v937_v59 }
  0xb7   :  { %828 = vmatpush3.bf16.msra.mxu0 %v938_v60  ;;  %850 = vmatpush3.bf16.msra.mxu1 %v939_v61 }
  0xb8   :  { %829 = vmatprep.subr.bf16.mxu0 %v940_v62  ;;  %851 = vmatprep.subr.bf16.mxu1 %v941_v63 }
  0xbb   :  { %830 = vmatpush3.bf16.msra.mxu0 %v942_v0  ;;  %852 = vmatpush3.bf16.msra.mxu1 %v943_v1 }
  0xbc   :  { %831 = vmatprep.subr.bf16.mxu0 %v944_v2  ;;  %853 = vmatprep.subr.bf16.mxu1 %v945_v3 }
  0xbf   :  { %832 = vmatpush3.bf16.msra.mxu0 %v946_v4  ;;  %854 = vmatpush3.bf16.msra.mxu1 %v947_v5 }
  0xc0   :  { %833 = vmatprep.subr.bf16.mxu0 %v948_v6  ;;  %855 = vmatprep.subr.bf16.mxu1 %v949_v7 }
  0xc3   :  { %834 = vmatpush3.bf16.msra.mxu0 %v950_v8  ;;  %856 = vmatpush3.bf16.msra.mxu1 %v951_v9 }
  0xc4   :  { %835 = vmatprep.subr.bf16.mxu0 %v952_v10  ;;  %857 = vmatprep.subr.bf16.mxu1 %v953_v11 }
  0xc7   :  { %836 = vmatpush3.bf16.msra.mxu0 %v954_v12  ;;  %858 = vmatpush3.bf16.msra.mxu1 %v955_v13 }
 0x16a   :  { %v337_v25 = vpop.f32.mrf.mxu0  ;;  %v378_v26 = vpop.f32.mrf.mxu1 }
 0x16b   :  { %v338_v27 = vadd.f32 %v337_v25, %v126_v21  ;;  %v379_v28 = vadd.f32 %v378_v26, %v134_v22 }
 0x16c   :  { %v339_v29 = vpop.f32.mrf.mxu0  ;;  %v380_v30 = vpop.f32.mrf.mxu1 }
 0x16d   :  { %v340_v31 = vadd.f32 %v339_v29, %v130_v23  ;;  %v381_v32 = vadd.f32 %v380_v30, %v138_v24  ;;  %v385_v33 = vmax.f32 %v338_v27, 0.0  ;;  %v387_v34 = vmax.f32 %v379_v28, 0.0 }
 0x16e   :  { %v341_v35 = vpop.f32.mrf.mxu0  ;;  %v382_v36 = vpop.f32.mrf.mxu1 }
 0x16f   :  { %v386_v37 = vmax.f32 %v340_v31, 0.0  ;;  %v388_v38 = vmax.f32 %v381_v32, 0.0  ;;  %v389_v43 = vpack.c.bf16 %v385_v33, %v385_v33  ;;  %v391_v44 = vpack.c.bf16 %v387_v34, %v387_v34 }
 0x170   :  { %v342_v39 = vpop.f32.mrf.mxu0  ;;  %v383_v40 = vpop.f32.mrf.mxu1 }
 0x171   :  { %v390_v41 = vpack.c.bf16 %v386_v37, %v386_v37  ;;  %v392_v42 = vpack.c.bf16 %v388_v38, %v388_v38 }
 0x173   :  { %688 = vmatprep.mubr.bf16.mxu0 %v390_v41  ;;  %728 = vmatprep.mubr.bf16.mxu1 %v392_v42 }
 0x174   :  { %689 = vmatmul.mubr.bf16.vlgmr.msra.gmra.mxu0 %v389_v43  ;;  %729 = vmatmul.mubr.bf16.vlgmr.msra.gmra.mxu1 %v391_v44 }
 0x234   :  { %v837_v45 = vpop.f32.mrf.mxu0  ;;  %v859_v46 = vpop.f32.mrf.mxu1 }
 0x236   :  { %v838_v48 = vpop.f32.mrf.mxu0  ;;  %v860_v49 = vpop.f32.mrf.mxu1 }
 0x237   :  { %v839_v50 = vadd.f32 %v838_v48, %v837_v45  ;;  %v861_v54 = vadd.f32 %v860_v49, %v859_v46 }
 0x238   :  { %v840_v51 = vpop.f32.mrf.mxu0  ;;  %v862_v52 = vpop.f32.mrf.mxu1 }
 0x239   :  { %v691_v53 = vadd.f32 %v839_v50, %v788_v47 }
 0x23a   :  { %v841_v55 = vpop.f32.mrf.mxu0  ;;  %v863_v56 = vpop.f32.mrf.mxu1 }
 0x23b   :  { %v731_v57 = vadd.f32 %v861_v54, %v691_v53 }
 0x23d   :  { %736 = vst [vmem:[#allocation7] sm:$0xff] %v731_v57 }
 0x23e   :  { %1007 = shalt.err (!%p1004_p0)
}
 0x23f   :  { %746 = dma.vmem_to_hbm [thread:$0]  %s744_s22, 128, %s1105_s7, [#allocation4]  }
 0x240   :  { %1020 = dma.done.wait [#allocation4], 128  }
 0x241   :  { %1021 = vsyncadd [#allocation4], 4294967168 }
 0x242   :  { %750 = vsyncpa [#allocation3], 1 }
 0x243   :  { %751 = vsyncpa [#allocation6], 1 }
 0x244   :  { %752 = vsyncpa [#allocation4], 1 }

</bundles_post_ra>
